<compile_context>
chip_gen: v7x
topology: tpu7x:2x2x1
jax: 0.10.0
libtpu: 0.0.40
codegen_flags: <defaults>
</compile_context>

<pallas_src>
import jax
import jax.numpy as jnp
from jax.experimental import pallas as pl
from jax.experimental.pallas import tpu as pltpu

_LANE = 128          # TPU lane width: output columns are padded to this for dense stores
_SMALL_BATCH = 4096  # at/below this a single ungridded call is cheapest (single tile)
_MAX_TILE = 8192     # cap rows per grid tile (keeps tiles tiny even on v7x's 64 MiB VMEM)


def _round_up(n, m):
    return ((n + m - 1) // m) * m


def _qnet_kernel(x_ref, w1_ref, b1_ref, w2_ref, b2_ref, o_ref):
    # hidden = relu(x @ W1 + b1)   (f32 operands, f32 MXU accumulation)
    h = jnp.dot(x_ref[...], w1_ref[...], preferred_element_type=jnp.float32)
    h = jnp.maximum(h + b1_ref[...], 0.0)
    # out = hidden @ W2 + b2       (W2/b2 pre-padded to a multiple of 128 lanes)
    out = jnp.dot(h, w2_ref[...], preferred_element_type=jnp.float32)
    o_ref[...] = (out + b2_ref[...]).astype(o_ref.dtype)


def pad_output_params(w2, b2):
    """Pad W2/b2 output columns up to a multiple of 128 lanes.

    Call ONCE at init/param-load time (not per forward) so the per-call path
    has zero pad ops; the forward wrapper slices back to the true out_size.
    """
    hid, out_size = w2.shape
    out_p = _round_up(out_size, _LANE)
    if out_p == out_size:
        return w2, b2
    w2_p = jnp.zeros((hid, out_p), w2.dtype).at[:, :out_size].set(w2)
    b2_p = jnp.zeros((1, out_p), b2.dtype).at[:, :out_size].set(b2)
    return w2_p, b2_p


def linear_qnet_forward(x, w1, b1, w2, b2, *, out_size=None):
    """relu(x @ W1 + b1) @ W2 + b2.

    x: (B, in), w1: (in, hid), b1: (1, hid).
    w2/b2 should be pre-padded with pad_output_params (out cols % 128 == 0) and
    out_size set to the true number of outputs; unpadded params also work
    (fallback pads per call, which is slower).
    """
    B, in_size = x.shape
    hid = w1.shape[1]
    if out_size is None:
        out_size = w2.shape[1]
    if w2.shape[1] % _LANE != 0:
        w2, b2 = pad_output_params(w2, b2)   # fallback path only
    out_p = w2.shape[1]

    cost = pl.CostEstimate(
        flops=2 * B * (in_size * hid + hid * out_p),
        transcendentals=0,
        bytes_accessed=4 * (B * (in_size + out_p) + in_size * hid + hid * out_p),
    )

    if B <= _SMALL_BATCH:
        # Single-tile problem: no grid, no pipeline prologue/epilogue overhead.
        out = pl.pallas_call(
            _qnet_kernel,
            out_shape=jax.ShapeDtypeStruct((B, out_p), x.dtype),
            in_specs=[pl.BlockSpec(memory_space=pltpu.MemorySpace.VMEM)] * 5,
            out_specs=pl.BlockSpec(memory_space=pltpu.MemorySpace.VMEM),
            cost_estimate=cost,
        )(x, w1, b1, w2, b2)
        return out[:, :out_size]

    # Large batch: aim for exactly 2 tiles (one per TensorCore on v7x, where
    # "parallel" shards the grid across cores); on single-TC v5e/v6e this is
    # just 2 near-minimal serial steps. Huge batches get more tiles via the
    # _MAX_TILE cap (8192x128 f32 out tile = 4 MiB, far under scoped VMEM).
    tm = min(_MAX_TILE, _round_up(pl.cdiv(B, 2), 8))
    grid = (pl.cdiv(B, tm),)   # ragged tail handled by Pallas; no x copy/pad

    out = pl.pallas_call(
        _qnet_kernel,
        out_shape=jax.ShapeDtypeStruct((B, out_p), x.dtype),
        grid=grid,
        in_specs=[
            pl.BlockSpec((tm, in_size), lambda i: (i, 0)),   # x: batch-tiled
            pl.BlockSpec((in_size, hid), lambda i: (0, 0)),  # W1: VMEM-resident
            pl.BlockSpec((1, hid), lambda i: (0, 0)),        # b1: VMEM-resident
            pl.BlockSpec((hid, out_p), lambda i: (0, 0)),    # W2: VMEM-resident
            pl.BlockSpec((1, out_p), lambda i: (0, 0)),      # b2: VMEM-resident
        ],
        out_specs=pl.BlockSpec((tm, out_p), lambda i: (i, 0)),
        compiler_params=pltpu.CompilerParams(
            dimension_semantics=("parallel",)),              # both TCs on v7x
        cost_estimate=cost,
    )(x, w1, b1, w2, b2)
    return out[:, :out_size]


def init_params(key, input_size, hidden_size, output_size, dtype=jnp.float32):
    """PyTorch nn.Linear default init: U(-1/sqrt(fan_in), 1/sqrt(fan_in)).

    Pass dtype=jnp.bfloat16 for the reduced-precision opt-in (MXU still
    accumulates in f32 via preferred_element_type).
    """
    k1, k2, k3, k4 = jax.random.split(key, 4)
    bound1 = 1.0 / (input_size ** 0.5)
    bound2 = 1.0 / (hidden_size ** 0.5)
    # stored as (in, out) == transpose of PyTorch's (out, in)
    w1 = jax.random.uniform(k1, (input_size, hidden_size), dtype,
                            minval=-bound1, maxval=bound1)
    b1 = jax.random.uniform(k2, (1, hidden_size), dtype,
                            minval=-bound1, maxval=bound1)
    w2 = jax.random.uniform(k3, (hidden_size, output_size), dtype,
                            minval=-bound2, maxval=bound2)
    b2 = jax.random.uniform(k4, (1, output_size), dtype,
                            minval=-bound2, maxval=bound2)
    return w1, b1, w2, b2


def reference_forward(x, w1, b1, w2, b2):
    h = jnp.maximum(x @ w1 + b1, 0.0)
    return h @ w2 + b2


if __name__ == "__main__":
    # Shapes consistent with the Snake Q-net usage of Linear_QNet:
    # input_size=11 (state vector), hidden_size=32, output_size=3 (actions).
    input_size, hidden_size, output_size = 11, 32, 3

    key = jax.random.PRNGKey(0)
    kx, kp, kx2, kx3 = jax.random.split(key, 4)
    w1, b1, w2, b2 = init_params(kp, input_size, hidden_size, output_size)
    # One-time lane-padding of the output layer (hoisted out of forward).
    w2_p, b2_p = pad_output_params(w2, b2)

    # --- small / inference-style batch: ungridded single-tile path ---
    batch = 8
    x = jax.random.normal(kx, (batch, input_size), jnp.float32)
    out = jax.block_until_ready(
        linear_qnet_forward(x, w1, b1, w2_p, b2_p, out_size=output_size))
    ref = reference_forward(x, w1, b1, w2, b2)
    assert out.shape == (batch, output_size)
    assert jnp.allclose(out, ref, atol=1e-5, rtol=1e-5)

    # --- training-style batch (B=1000): still the single-tile path now ---
    train_batch = 1000
    x_train = jax.random.normal(kx2, (train_batch, input_size), jnp.float32)
    out_train = jax.block_until_ready(
        linear_qnet_forward(x_train, w1, b1, w2_p, b2_p, out_size=output_size))
    ref_train = reference_forward(x_train, w1, b1, w2, b2)
    assert out_train.shape == (train_batch, output_size)
    assert jnp.allclose(out_train, ref_train, atol=1e-5, rtol=1e-5)

    # --- very large batch: gridded 2-tile path with ragged tail (no x copy) ---
    big_batch = 5000  # > _SMALL_BATCH, not a multiple of the tile -> masked tail
    x_big = jax.random.normal(kx3, (big_batch, input_size), jnp.float32)
    out_big = jax.block_until_ready(
        linear_qnet_forward(x_big, w1, b1, w2_p, b2_p, out_size=output_size))
    ref_big = reference_forward(x_big, w1, b1, w2, b2)
    assert out_big.shape == (big_batch, output_size)
    assert jnp.allclose(out_big, ref_big, atol=1e-5, rtol=1e-5)

    # TODO(synk): Linear_QNet.save() (torch.save of state_dict) is host-side
    # file I/O with no Pallas equivalent; intentionally not implemented.
    print("KERNEL_OK")
</pallas_src>

<mosaic_0001>
module attributes {stable_mosaic.version = 11 : i64} {
  func.func @_qnet_kernel(%arg0: memref<8x11xf32, #tpu.memory_space<vmem>>, %arg1: memref<11x32xf32, #tpu.memory_space<vmem>>, %arg2: memref<1x32xf32, #tpu.memory_space<vmem>>, %arg3: memref<32x128xf32, #tpu.memory_space<vmem>>, %arg4: memref<1x128xf32, #tpu.memory_space<vmem>>, %arg5: memref<8x128xf32, #tpu.memory_space<vmem>>) attributes {dimension_semantics = [], scalar_prefetch = 0 : i64, scratch_operands = 0 : i64, tpu.core_type = #tpu.core_type<tc>} {
    %c0 = arith.constant 0 : index
    %c0_0 = arith.constant 0 : index
    %0 = vector.load %arg0[%c0, %c0_0] : memref<8x11xf32, #tpu.memory_space<vmem>>, vector<8x11xf32>
    %c0_1 = arith.constant 0 : index
    %c0_2 = arith.constant 0 : index
    %1 = vector.load %arg1[%c0_1, %c0_2] : memref<11x32xf32, #tpu.memory_space<vmem>>, vector<11x32xf32>
    %cst = arith.constant dense<0.000000e+00> : vector<8x32xf32>
    %2 = tpu.matmul %0, %1, %cst {dimension_numbers = #tpu.dot_dimension_numbers<[1], [0], [0], [1], [0, 0, 1, 1], [], []>} : vector<8x11xf32>, vector<11x32xf32>, vector<8x32xf32> -> vector<8x32xf32>
    %c0_3 = arith.constant 0 : index
    %c0_4 = arith.constant 0 : index
    %3 = vector.load %arg2[%c0_3, %c0_4] : memref<1x32xf32, #tpu.memory_space<vmem>>, vector<1x32xf32>
    %4 = vector.broadcast %3 : vector<1x32xf32> to vector<8x32xf32>
    %5 = arith.addf %2, %4 : vector<8x32xf32>
    %cst_5 = arith.constant 0.000000e+00 : f32
    %6 = vector.broadcast %cst_5 : f32 to vector<8x32xf32>
    %7 = arith.maximumf %5, %6 : vector<8x32xf32>
    %c0_6 = arith.constant 0 : index
    %c0_7 = arith.constant 0 : index
    %8 = vector.load %arg3[%c0_6, %c0_7] : memref<32x128xf32, #tpu.memory_space<vmem>>, vector<32x128xf32>
    %cst_8 = arith.constant dense<0.000000e+00> : vector<8x128xf32>
    %9 = tpu.matmul %7, %8, %cst_8 {dimension_numbers = #tpu.dot_dimension_numbers<[1], [0], [0], [1], [0, 0, 1, 1], [], []>} : vector<8x32xf32>, vector<32x128xf32>, vector<8x128xf32> -> vector<8x128xf32>
    %c0_9 = arith.constant 0 : index
    %c0_10 = arith.constant 0 : index
    %10 = vector.load %arg4[%c0_9, %c0_10] : memref<1x128xf32, #tpu.memory_space<vmem>>, vector<1x128xf32>
    %11 = vector.broadcast %10 : vector<1x128xf32> to vector<8x128xf32>
    %12 = arith.addf %9, %11 : vector<8x128xf32>
    %c0_11 = arith.constant 0 : index
    %c0_12 = arith.constant 0 : index
    %13 = vector.load %arg5[%c0_11, %c0_12] : memref<8x128xf32, #tpu.memory_space<vmem>>, vector<8x128xf32>
    tpu.vector_store %arg5[%c0_11, %c0_12], %12 {strides = array<i32>} : memref<8x128xf32, #tpu.memory_space<vmem>>, vector<8x128xf32>,
    return
  }
}

</mosaic_0001>

<bundles_post_ra>
// kernel: tpu_custom_call.1
= control target key start
LH: loop header
LB: loop body
LE: loop exit
PB: predicated region body
PF: predicated region fallthrough
CT: control target
= control target key end

     0   :  { %10 = vsyncpa [#allocation3], 0  ;;  %s496_s0 = inlined_call_operand.hbm [shape: f32[8,11], index: 0, kind: input, shape index: {}]   ;;  %s497_s1 = inlined_call_operand.hbm [shape: f32[11,32], index: 1, kind: input, shape index: {}]   ;;  %s498_s2 = inlined_call_operand.vmem [shape: f32[1,32], index: 2, kind: input, shape index: {}]   ;;  %s499_s3 = inlined_call_operand.hbm [shape: f32[32,128], index: 3, kind: input, shape index: {}]   ;;  %s500_s4 = inlined_call_operand.vmem [shape: f32[1,128], index: 4, kind: input, shape index: {}]   ;;  %s501_s5 = inlined_call_operand.hbm [shape: f32[8,128], index: 5, kind: output, shape index: {}]  }
   0x1   :  { %11 = vsyncpa [#allocation6], 0 }
   0x2   :  { %12 = vsyncpa [#allocation4], 0  ;;  %s396_s18 = smov [#allocation5]   ;;  %s302_s22 = scalar_lea.hbm %s497_s1, 256 }
   0x3   :  { %s28_s19 = sshll.u32 %s396_s18, 4  ;;  %p303_p0 = scmp.ne.s32.totalorder %s497_s1, %s302_s22  ;;  %s29_s19 = int_to_ptr.vmem [resolvable:$true] %s28_s19 }
   0x4   :  { %p306_p1 = scmp.lt.u32.totalorder %s302_s22, %s497_s1 }
   0x6   :  { %p308_p2 = pnand %p306_p1, %p303_p0 }
   0x8   :  { %311 = shalt.err (!%p308_p2)
}
   0x9   :  { %s312_s27 = scalar_lea.vmem %s29_s19, 256  ;;  %p317_p4 = scmp.lt.s32.totalorder %s29_s19, %s29_s19 }
   0xa   :  { %p313_p3 = scmp.ne.s32.totalorder %s29_s19, %s312_s27  ;;  %p318_p5 = scmp.lt.s32.totalorder %s312_s27, %s312_s27 }
   0xc   :  { %p319_p6 = por %p318_p5, %p317_p4 }
   0xe   :  { %p320_p7 = pnand %p319_p6, %p313_p3 }
  0x10   :  { %323 = shalt.err (!%p320_p7)
}
  0x11   :  { %s397_s28 = smov 128   ;;  %s398_s29 = smov 8  }
  0x12   :  { %34 = dma.hbm_to_vmem [thread:$0]  %s497_s1, 256, %s29_s19, [#allocation6], %s397_s28, %s397_s28, %s398_s29  }
  0x13   :  { %s399_s7 = smov [#allocation2]   ;;  %s400_s9 = smov [#allocation7]  }
  0x14   :  { %s19_s8 = sshll.u32 %s399_s7, 4  ;;  %s42_s10 = sshll.u32 %s400_s9, 4  ;;  %s20_s8 = int_to_ptr.vmem [resolvable:$true] %s19_s8  ;;  %s43_s10 = int_to_ptr.vmem [resolvable:$true] %s42_s10 }
  0x15   :  { %s324_s13 = scalar_lea.hbm %s496_s0, 128 }
  0x16   :  { %p325_p8 = scmp.ne.s32.totalorder %s496_s0, %s324_s13  ;;  %p328_p9 = scmp.lt.u32.totalorder %s324_s13, %s496_s0 }
  0x18   :  { %p330_p10 = pnand %p328_p9, %p325_p8 }
  0x1a   :  { %333 = shalt.err (!%p330_p10)
}
  0x1b   :  { %s334_s1 = scalar_lea.vmem %s20_s8, 128  ;;  %p339_p12 = scmp.lt.s32.totalorder %s20_s8, %s20_s8 }
  0x1c   :  { %p335_p11 = scmp.ne.s32.totalorder %s20_s8, %s334_s1  ;;  %p340_p13 = scmp.lt.s32.totalorder %s334_s1, %s334_s1 }
  0x1e   :  { %p341_p0 = por %p340_p13, %p339_p12 }
  0x20   :  { %p342_p1 = pnand %p341_p0, %p335_p11 }
  0x22   :  { %345 = shalt.err (!%p342_p1)
}
  0x23   :  { %22 = dma.hbm_to_vmem [thread:$0]  %s496_s0, 128, %s20_s8, [#allocation3]  }
  0x24   :  { %s346_s22 = scalar_lea.hbm %s499_s3, 512 }
  0x25   :  { %p347_p2 = scmp.ne.s32.totalorder %s499_s3, %s346_s22  ;;  %p350_p3 = scmp.lt.u32.totalorder %s346_s22, %s499_s3 }
  0x27   :  { %p352_p4 = pnand %p350_p3, %p347_p2 }
  0x29   :  { %355 = shalt.err (!%p352_p4)
}
  0x2a   :  { %s356_s27 = scalar_lea.vmem %s43_s10, 512  ;;  %p361_p6 = scmp.lt.s32.totalorder %s43_s10, %s43_s10 }
  0x2b   :  { %p357_p5 = scmp.ne.s32.totalorder %s43_s10, %s356_s27  ;;  %p362_p7 = scmp.lt.s32.totalorder %s356_s27, %s356_s27 }
  0x2d   :  { %p363_p8 = por %p362_p7, %p361_p6 }
  0x2f   :  { %p364_p9 = pnand %p363_p8, %p357_p5 }
  0x31   :  { %367 = shalt.err (!%p364_p9)
}
  0x32   :  { %48 = dma.hbm_to_vmem [thread:$0]  %s499_s3, 512, %s43_s10, [#allocation6], %s397_s28, %s397_s28, %s398_s29  }
  0x33   :  { %390 = dma.done.wait [#allocation3], 128  }
  0x34   :  { %391 = vsyncadd [#allocation3], 4294967168 }
  0x35   :  { %392 = dma.done.wait [#allocation6], 768  }
  0x36   :  { %393 = vsyncadd [#allocation6], 4294966528  ;;  %v401_v0 = vmov 0.0|0.0   ;;  %vm402_vm0 = vmmov 0   ;;  %v403_v1 = vmov 0.0   ;;  %vm74_vm1 = vcmask 1042432  }
  0x37   :  { %282 = vmatprep.subr.bf16.mxu0 %v401_v0  ;;  %286 = vmatprep.subr.bf16.mxu1 %v401_v0  ;;  %v61_v2 = vld [vmem:[#allocation5] sm:$0xff]  ;;  %v62_v3 = vld [vmem:[#allocation5 + $0x8] sm:$0x7]  ;;  %vm404_vm2 = vmmov 1   ;;  %v149_v5 = vld [vmem:[#allocation7] sm:$0xff]  ;;  %vm70_vm4 = vcmask 89088  }
  0x38   :  { %268 = vmatprep.mubr.msk.f32.mxu0 %vm402_vm0, %v403_v1  ;;  %279 = vmatprep.mubr.msk.f32.mxu1 %vm402_vm0, %v403_v1  ;;  %vm284_vm3 = vmpackc.low %vm74_vm1, %vm404_vm2  ;;  %v283_v4 = vpack.c.bf16 %v62_v3, %v61_v2  ;;  %v150_v6 = vld [vmem:[#allocation7 + $0x8] sm:$0xff]  ;;  %v151_v9 = vld [vmem:[#allocation7 + $0x10] sm:$0xff]  ;;  %vm160_vm5 = vcmask 261120   ;;  %s405_s7 = smov [#allocation8]  }
  0x39   :  { %v287_v7 = vpack.c.bf16 %v150_v6, %v149_v5  ;;  %v60_v8 = vld [vmem:[#allocation2] sm:$0xff]  ;;  %v152_v10 = vld [vmem:[#allocation7 + $0x18] sm:$0xff]  ;;  %s241_s8 = sshll.u32 %s405_s7, 4  ;;  %s242_s8 = int_to_ptr.vmem [resolvable:$true] %s241_s8 }
  0x3a   :  { %285 = vmatpush3.bf16.msk.msra.mxu0 %vm284_vm3, %v283_v4  ;;  %v290_v11 = vpack.c.bf16 %v152_v10, %v151_v9  ;;  %v251_v12 = vld [vmem:[%s498_s2] ss:$0 sm:$0xff]  ;;  %s368_s9 = scalar_lea.vmem %s242_s8, 128  ;;  %p373_p11 = scmp.lt.s32.totalorder %s242_s8, %s242_s8 }
  0x3b   :  { %288 = vmatpush3.bf16.msra.mxu1 %v287_v7  ;;  %v254_v17 = vld [vmem:[%s500_s4] ss:$0 sm:$0xff]  ;;  %p369_p10 = scmp.ne.s32.totalorder %s242_s8, %s368_s9  ;;  %p374_p12 = scmp.lt.s32.totalorder %s368_s9, %s368_s9 }
  0x3c   :  { %289 = vmatprep.subr.bf16.mxu1 %v401_v0 }
  0x3d   :  { %269 = vmatmul.mubr.msk.f32.vlgmr.msra.gmra.mrb[0].mxu0 %vm70_vm4, %v60_v8  ;;  %p375_p13 = por %p374_p12, %p373_p11 }
  0x3f   :  { %291 = vmatpush3.bf16.msra.mxu1 %v290_v11  ;;  %p376_p0 = pnand %p375_p13, %p369_p10 }
 0x110   :  { %v144_v13 = vpop.f32.mrb[0].mxu0 }
 0x111   :  { %v145_v14 = vadd.f32 %v251_v12, %v144_v13  ;;  %v270_v15 = vpop.f32.mrb[1].mxu0 }
 0x113   :  { %v148_v16 = vmax.f32 %v145_v14, 0.0 }
 0x115   :  { %280 = vmatmul.mubr.msk.f32.vlgmr.msra.gmra.mrb[0].mxu1 %vm160_vm5, %v148_v16 }
 0x1e8   :  { %v230_v18 = vpop.f32.mrb[0].mxu1 }
 0x1e9   :  { %v231_v19 = vadd.f32 %v254_v17, %v230_v18  ;;  %v281_v20 = vpop.f32.mrb[1].mxu1 }
 0x1eb   :  { %234 = vst [vmem:[#allocation8] sm:$0xff] %v231_v19 }
 0x1ec   :  { %379 = shalt.err (!%p376_p0)
}
 0x1ed   :  { %s380_s11 = scalar_lea.hbm %s501_s5, 128 }
 0x1ee   :  { %p381_p1 = scmp.ne.s32.totalorder %s501_s5, %s380_s11  ;;  %p384_p2 = scmp.lt.u32.totalorder %s380_s11, %s501_s5 }
 0x1f0   :  { %p386_p3 = pnand %p384_p2, %p381_p1 }
 0x1f2   :  { %389 = shalt.err (!%p386_p3)
}
 0x1f3   :  { %244 = dma.vmem_to_hbm [thread:$0]  %s242_s8, 128, %s501_s5, [#allocation4]  }
 0x1f4   :  { %394 = dma.done.wait [#allocation4], 128  }
 0x1f5   :  { %395 = vsyncadd [#allocation4], 4294967168 }
 0x1f6   :  { %248 = vsyncpa [#allocation3], 1 }
 0x1f7   :  { %249 = vsyncpa [#allocation6], 1 }
 0x1f8   :  { %250 = vsyncpa [#allocation4], 1 }

</bundles_post_ra>
